<compile_context>
chip_gen: v5e
topology: v5e:2x2
jax: 0.10.0
libtpu: 0.0.40
codegen_flags: <defaults>
</compile_context>

<pallas_src>
import jax
import jax.numpy as jnp
from jax.experimental import pallas as pl
from jax.experimental.pallas import tpu as pltpu

# Buffers from __init__ (deterministic, synthetic)
DATA_WEIGHT = 1.0
DEPTH_LOSS_WEIGHT = 100.0


def _make_camera_init_loss_kernel(init_joints_idxs, num_joints):
    """Build the kernel with the static joint indices baked in as constants."""
    idxs = tuple(int(i) for i in init_joints_idxs)

    def kernel(joints_ref, gt_ref, rot_ref, trans_ref, focal_ref,
               center_ref, te_ref, out_ref):
        # joints_ref : VMEM [B, J, 3] f32
        # gt_ref     : VMEM [B, J, 2] f32
        # rot_ref    : VMEM [B, 3, 3] f32
        # trans_ref  : VMEM [B, 3]    f32
        # focal_ref  : VMEM [B, 2]    f32
        # center_ref : VMEM [B, 2]    f32
        # te_ref     : VMEM [B, 3]    f32   (trans_estimation)
        # out_ref    : SMEM [1, 1]    f32   scalar loss

        # In-kernel channel split (tiny on-chip relayout, no HBM round-trip).
        p = joints_ref[...]                      # [B, J, 3]
        g = gt_ref[...]                          # [B, J, 2]
        px = p[:, :, 0]; py = p[:, :, 1]; pz = p[:, :, 2]   # [B, J]
        gx = g[:, :, 0]; gy = g[:, :, 1]                    # [B, J]

        rot = rot_ref[...]                       # [B, 3, 3]
        t = trans_ref[...]                       # [B, 3]
        f = focal_ref[...]                       # [B, 2]
        c = center_ref[...]                      # [B, 2]
        te = te_ref[...]                         # [B, 3]

        tx = t[:, 0:1]; ty = t[:, 1:2]; tz = t[:, 2:3]       # [B, 1]
        fx = f[:, 0:1]; fy = f[:, 1:2]
        cx = c[:, 0:1]; cy = c[:, 1:2]
        te_z = te[:, 2:3]

        def rc(k, i):                            # rotation element -> [B, 1]
            return rot[:, k:k + 1, i]

        # Camera transform: R @ p + t  (einsum 'bki,bji->bjk' as 9 VPU FMAs;
        # a K=3 contraction on the MXU would be <3% utilization + FIFO latency)
        camx = rc(0, 0) * px + rc(0, 1) * py + rc(0, 2) * pz + tx
        camy = rc(1, 0) * px + rc(1, 1) * py + rc(1, 2) * pz + ty
        camz = rc(2, 0) * px + rc(2, 1) * py + rc(2, 2) * pz + tz

        # Perspective divide, intrinsics diag(fx, fy), principal point.
        # Exact divide kept for tolerance safety (micro-opt to EUP only if the
        # body ever becomes the bottleneck).
        inv_z = 1.0 / camz
        imgx = fx * camx * inv_z + cx
        imgy = fy * camy * inv_z + cy

        err = (gx - imgx) ** 2 + (gy - imgy) ** 2            # [B, J]

        # Static joint selection built in-kernel: iota + K compares/ORs (VPU).
        # Select (not multiply) so NaN/Inf from unselected joints cannot leak,
        # matching PyTorch's index_select-after-projection behavior.
        lane = jax.lax.broadcasted_iota(jnp.int32, (1, num_joints), 1)
        sel = lane == idxs[0]
        for j in idxs[1:]:
            sel = jnp.logical_or(sel, lane == j)
        err = jnp.where(sel, err, 0.0)

        joint_sum = jnp.sum(err)
        depth_sum = jnp.sum((tz - te_z) ** 2)

        out_ref[0, 0] = (jnp.float32(DATA_WEIGHT ** 2) * joint_sum
                         + jnp.float32(DEPTH_LOSS_WEIGHT ** 2) * depth_sum)

    return kernel


def smplify_camera_init_loss(joints, gt_joints, rotation, translation,
                             focal, center, trans_estimation, init_joints_idxs):
    """JAX wrapper: raw inputs straight into VMEM, no wrapper-side packing.

    joints           : [B, J, 3]  body_model_output.joints
    gt_joints        : [B, J, 2]
    rotation         : [B, 3, 3]  camera.rotation
    translation      : [B, 3]     camera.translation
    focal            : [B, 2]     (focal_length_x, focal_length_y)
    center           : [B, 2]     camera.center
    trans_estimation : [B, 3]
    init_joints_idxs : static tuple of ints (registered buffer)

    Returns a (1, 1) float32 array (consumer extracts the scalar).
    """
    _, J, _ = joints.shape
    f32 = jnp.float32

    kernel = _make_camera_init_loss_kernel(init_joints_idxs, J)
    vmem = pl.BlockSpec(memory_space=pltpu.MemorySpace.VMEM)

    return pl.pallas_call(
        kernel,
        out_shape=jax.ShapeDtypeStruct((1, 1), jnp.float32),
        in_specs=[vmem] * 7,
        out_specs=pl.BlockSpec(memory_space=pltpu.MemorySpace.SMEM),
    )(joints.astype(f32), gt_joints.astype(f32), rotation.astype(f32),
      translation.astype(f32), focal.astype(f32), center.astype(f32),
      trans_estimation.astype(f32))


def reference_loss(joints, gt_joints, rotation, translation,
                   focal, center, trans_estimation, init_joints_idxs):
    """Pure-JAX reference mirroring the PyTorch forward (for verification)."""
    idxs = jnp.asarray(init_joints_idxs, dtype=jnp.int32)
    pc = jnp.einsum('bki,bji->bjk', rotation, joints) + translation[:, None, :]
    img = pc[..., :2] / pc[..., 2:3]
    img = img * focal[:, None, :] + center[:, None, :]
    joint_error = (gt_joints[:, idxs] - img[:, idxs]) ** 2
    joint_loss = jnp.sum(joint_error) * (DATA_WEIGHT ** 2)
    depth_loss = (DEPTH_LOSS_WEIGHT ** 2) * jnp.sum(
        (translation[:, 2] - trans_estimation[:, 2]) ** 2)
    return joint_loss + depth_loss


def _rot_z(a):
    c, s = jnp.cos(a), jnp.sin(a)
    z, o = jnp.zeros_like(a), jnp.ones_like(a)
    return jnp.stack([jnp.stack([c, -s, z], -1),
                      jnp.stack([s, c, z], -1),
                      jnp.stack([z, z, o], -1)], -2)


def _rot_x(a):
    c, s = jnp.cos(a), jnp.sin(a)
    z, o = jnp.zeros_like(a), jnp.ones_like(a)
    return jnp.stack([jnp.stack([o, z, z], -1),
                      jnp.stack([z, c, -s], -1),
                      jnp.stack([z, s, c], -1)], -2)


if __name__ == "__main__":
    key = jax.random.PRNGKey(0)
    B, J = 2, 16
    init_joints_idxs = (0, 2, 5, 8, 11, 15)  # K = 6 selected joints

    k1, k2, k3, k4, k5, k6 = jax.random.split(key, 6)
    joints = 0.5 * jax.random.normal(k1, (B, J, 3), dtype=jnp.float32)
    gt_joints = jax.random.uniform(k2, (B, J, 2), dtype=jnp.float32,
                                   minval=0.0, maxval=256.0)
    # Non-identity rotation to catch convention bugs.
    angles = jax.random.uniform(k6, (B, 2), dtype=jnp.float32,
                                minval=-0.4, maxval=0.4)
    rotation = jnp.einsum('bij,bjk->bik', _rot_z(angles[:, 0]), _rot_x(angles[:, 1]))
    translation = jnp.concatenate(
        [jax.random.normal(k3, (B, 2), dtype=jnp.float32) * 0.1,
         jax.random.uniform(k4, (B, 1), dtype=jnp.float32, minval=3.0, maxval=5.0)],
        axis=-1)
    focal = jnp.full((B, 2), 500.0, dtype=jnp.float32)
    center = jnp.full((B, 2), 128.0, dtype=jnp.float32)
    trans_estimation = translation + 0.05 * jax.random.normal(
        k5, (B, 3), dtype=jnp.float32)

    loss = smplify_camera_init_loss(joints, gt_joints, rotation, translation,
                                    focal, center, trans_estimation,
                                    init_joints_idxs)
    loss = jax.block_until_ready(loss)

    ref = reference_loss(joints, gt_joints, rotation, translation,
                         focal, center, trans_estimation, init_joints_idxs)
    ref = jax.block_until_ready(ref)

    # Scalar extraction happens here at the consumer, not in the hot path.
    assert jnp.allclose(loss[0, 0], ref, rtol=1e-4, atol=1e-3), (loss, ref)
    print("KERNEL_OK")
</pallas_src>

<mosaic_0001>
module attributes {stable_mosaic.version = 11 : i64} {
  func.func @kernel(%arg0: memref<2x16x3xf32, #tpu.memory_space<vmem>>, %arg1: memref<2x16x2xf32, #tpu.memory_space<vmem>>, %arg2: memref<2x3x3xf32, #tpu.memory_space<vmem>>, %arg3: memref<2x3xf32, #tpu.memory_space<vmem>>, %arg4: memref<2x2xf32, #tpu.memory_space<vmem>>, %arg5: memref<2x2xf32, #tpu.memory_space<vmem>>, %arg6: memref<2x3xf32, #tpu.memory_space<vmem>>, %arg7: memref<1x1xf32, #tpu.memory_space<smem>>) attributes {dimension_semantics = [], scalar_prefetch = 0 : i64, scratch_operands = 0 : i64, tpu.core_type = #tpu.core_type<tc>} {
    %c0 = arith.constant 0 : index
    %c0_0 = arith.constant 0 : index
    %c0_1 = arith.constant 0 : index
    %0 = vector.load %arg0[%c0, %c0_0, %c0_1] : memref<2x16x3xf32, #tpu.memory_space<vmem>>, vector<2x16x3xf32>
    %c0_2 = arith.constant 0 : index
    %c0_3 = arith.constant 0 : index
    %c0_4 = arith.constant 0 : index
    %1 = vector.load %arg1[%c0_2, %c0_3, %c0_4] : memref<2x16x2xf32, #tpu.memory_space<vmem>>, vector<2x16x2xf32>
    %2 = vector.extract_strided_slice %0 {offsets = [0, 0, 0], sizes = [2, 16, 1], strides = [1, 1, 1]} : vector<2x16x3xf32> to vector<2x16x1xf32>
    %3 = vector.shape_cast %2 : vector<2x16x1xf32> to vector<2x16xf32>
    %4 = vector.extract_strided_slice %0 {offsets = [0, 0, 1], sizes = [2, 16, 1], strides = [1, 1, 1]} : vector<2x16x3xf32> to vector<2x16x1xf32>
    %5 = vector.shape_cast %4 : vector<2x16x1xf32> to vector<2x16xf32>
    %6 = vector.extract_strided_slice %0 {offsets = [0, 0, 2], sizes = [2, 16, 1], strides = [1, 1, 1]} : vector<2x16x3xf32> to vector<2x16x1xf32>
    %7 = vector.shape_cast %6 : vector<2x16x1xf32> to vector<2x16xf32>
    %8 = vector.extract_strided_slice %1 {offsets = [0, 0, 0], sizes = [2, 16, 1], strides = [1, 1, 1]} : vector<2x16x2xf32> to vector<2x16x1xf32>
    %9 = vector.shape_cast %8 : vector<2x16x1xf32> to vector<2x16xf32>
    %10 = vector.extract_strided_slice %1 {offsets = [0, 0, 1], sizes = [2, 16, 1], strides = [1, 1, 1]} : vector<2x16x2xf32> to vector<2x16x1xf32>
    %11 = vector.shape_cast %10 : vector<2x16x1xf32> to vector<2x16xf32>
    %c0_5 = arith.constant 0 : index
    %c0_6 = arith.constant 0 : index
    %c0_7 = arith.constant 0 : index
    %12 = vector.load %arg2[%c0_5, %c0_6, %c0_7] : memref<2x3x3xf32, #tpu.memory_space<vmem>>, vector<2x3x3xf32>
    %c0_8 = arith.constant 0 : index
    %c0_9 = arith.constant 0 : index
    %13 = vector.load %arg3[%c0_8, %c0_9] : memref<2x3xf32, #tpu.memory_space<vmem>>, vector<2x3xf32>
    %c0_10 = arith.constant 0 : index
    %c0_11 = arith.constant 0 : index
    %14 = vector.load %arg4[%c0_10, %c0_11] : memref<2x2xf32, #tpu.memory_space<vmem>>, vector<2x2xf32>
    %c0_12 = arith.constant 0 : index
    %c0_13 = arith.constant 0 : index
    %15 = vector.load %arg5[%c0_12, %c0_13] : memref<2x2xf32, #tpu.memory_space<vmem>>, vector<2x2xf32>
    %c0_14 = arith.constant 0 : index
    %c0_15 = arith.constant 0 : index
    %16 = vector.load %arg6[%c0_14, %c0_15] : memref<2x3xf32, #tpu.memory_space<vmem>>, vector<2x3xf32>
    %17 = vector.extract_strided_slice %13 {offsets = [0, 0], sizes = [2, 1], strides = [1, 1]} : vector<2x3xf32> to vector<2x1xf32>
    %18 = vector.extract_strided_slice %13 {offsets = [0, 1], sizes = [2, 1], strides = [1, 1]} : vector<2x3xf32> to vector<2x1xf32>
    %19 = vector.extract_strided_slice %13 {offsets = [0, 2], sizes = [2, 1], strides = [1, 1]} : vector<2x3xf32> to vector<2x1xf32>
    %20 = vector.extract_strided_slice %14 {offsets = [0, 0], sizes = [2, 1], strides = [1, 1]} : vector<2x2xf32> to vector<2x1xf32>
    %21 = vector.extract_strided_slice %14 {offsets = [0, 1], sizes = [2, 1], strides = [1, 1]} : vector<2x2xf32> to vector<2x1xf32>
    %22 = vector.extract_strided_slice %15 {offsets = [0, 0], sizes = [2, 1], strides = [1, 1]} : vector<2x2xf32> to vector<2x1xf32>
    %23 = vector.extract_strided_slice %15 {offsets = [0, 1], sizes = [2, 1], strides = [1, 1]} : vector<2x2xf32> to vector<2x1xf32>
    %24 = vector.extract_strided_slice %16 {offsets = [0, 2], sizes = [2, 1], strides = [1, 1]} : vector<2x3xf32> to vector<2x1xf32>
    %25 = vector.extract_strided_slice %12 {offsets = [0, 0, 0], sizes = [2, 1, 1], strides = [1, 1, 1]} : vector<2x3x3xf32> to vector<2x1x1xf32>
    %26 = vector.shape_cast %25 : vector<2x1x1xf32> to vector<2x1xf32>
    %27 = vector.broadcast %26 : vector<2x1xf32> to vector<2x16xf32>
    %28 = arith.mulf %27, %3 : vector<2x16xf32>
    %29 = vector.extract_strided_slice %12 {offsets = [0, 0, 1], sizes = [2, 1, 1], strides = [1, 1, 1]} : vector<2x3x3xf32> to vector<2x1x1xf32>
    %30 = vector.shape_cast %29 : vector<2x1x1xf32> to vector<2x1xf32>
    %31 = vector.broadcast %30 : vector<2x1xf32> to vector<2x16xf32>
    %32 = arith.mulf %31, %5 : vector<2x16xf32>
    %33 = arith.addf %28, %32 : vector<2x16xf32>
    %34 = vector.extract_strided_slice %12 {offsets = [0, 0, 2], sizes = [2, 1, 1], strides = [1, 1, 1]} : vector<2x3x3xf32> to vector<2x1x1xf32>
    %35 = vector.shape_cast %34 : vector<2x1x1xf32> to vector<2x1xf32>
    %36 = vector.broadcast %35 : vector<2x1xf32> to vector<2x16xf32>
    %37 = arith.mulf %36, %7 : vector<2x16xf32>
    %38 = arith.addf %33, %37 : vector<2x16xf32>
    %39 = vector.broadcast %17 : vector<2x1xf32> to vector<2x16xf32>
    %40 = arith.addf %38, %39 : vector<2x16xf32>
    %41 = vector.extract_strided_slice %12 {offsets = [0, 1, 0], sizes = [2, 1, 1], strides = [1, 1, 1]} : vector<2x3x3xf32> to vector<2x1x1xf32>
    %42 = vector.shape_cast %41 : vector<2x1x1xf32> to vector<2x1xf32>
    %43 = vector.broadcast %42 : vector<2x1xf32> to vector<2x16xf32>
    %44 = arith.mulf %43, %3 : vector<2x16xf32>
    %45 = vector.extract_strided_slice %12 {offsets = [0, 1, 1], sizes = [2, 1, 1], strides = [1, 1, 1]} : vector<2x3x3xf32> to vector<2x1x1xf32>
    %46 = vector.shape_cast %45 : vector<2x1x1xf32> to vector<2x1xf32>
    %47 = vector.broadcast %46 : vector<2x1xf32> to vector<2x16xf32>
    %48 = arith.mulf %47, %5 : vector<2x16xf32>
    %49 = arith.addf %44, %48 : vector<2x16xf32>
    %50 = vector.extract_strided_slice %12 {offsets = [0, 1, 2], sizes = [2, 1, 1], strides = [1, 1, 1]} : vector<2x3x3xf32> to vector<2x1x1xf32>
    %51 = vector.shape_cast %50 : vector<2x1x1xf32> to vector<2x1xf32>
    %52 = vector.broadcast %51 : vector<2x1xf32> to vector<2x16xf32>
    %53 = arith.mulf %52, %7 : vector<2x16xf32>
    %54 = arith.addf %49, %53 : vector<2x16xf32>
    %55 = vector.broadcast %18 : vector<2x1xf32> to vector<2x16xf32>
    %56 = arith.addf %54, %55 : vector<2x16xf32>
    %57 = vector.extract_strided_slice %12 {offsets = [0, 2, 0], sizes = [2, 1, 1], strides = [1, 1, 1]} : vector<2x3x3xf32> to vector<2x1x1xf32>
    %58 = vector.shape_cast %57 : vector<2x1x1xf32> to vector<2x1xf32>
    %59 = vector.broadcast %58 : vector<2x1xf32> to vector<2x16xf32>
    %60 = arith.mulf %59, %3 : vector<2x16xf32>
    %61 = vector.extract_strided_slice %12 {offsets = [0, 2, 1], sizes = [2, 1, 1], strides = [1, 1, 1]} : vector<2x3x3xf32> to vector<2x1x1xf32>
    %62 = vector.shape_cast %61 : vector<2x1x1xf32> to vector<2x1xf32>
    %63 = vector.broadcast %62 : vector<2x1xf32> to vector<2x16xf32>
    %64 = arith.mulf %63, %5 : vector<2x16xf32>
    %65 = arith.addf %60, %64 : vector<2x16xf32>
    %66 = vector.extract_strided_slice %12 {offsets = [0, 2, 2], sizes = [2, 1, 1], strides = [1, 1, 1]} : vector<2x3x3xf32> to vector<2x1x1xf32>
    %67 = vector.shape_cast %66 : vector<2x1x1xf32> to vector<2x1xf32>
    %68 = vector.broadcast %67 : vector<2x1xf32> to vector<2x16xf32>
    %69 = arith.mulf %68, %7 : vector<2x16xf32>
    %70 = arith.addf %65, %69 : vector<2x16xf32>
    %71 = vector.broadcast %19 : vector<2x1xf32> to vector<2x16xf32>
    %72 = arith.addf %70, %71 : vector<2x16xf32>
    %cst = arith.constant 1.000000e+00 : f32
    %73 = vector.broadcast %cst : f32 to vector<2x16xf32>
    %74 = arith.divf %73, %72 : vector<2x16xf32>
    %75 = vector.broadcast %20 : vector<2x1xf32> to vector<2x16xf32>
    %76 = arith.mulf %75, %40 : vector<2x16xf32>
    %77 = arith.mulf %76, %74 : vector<2x16xf32>
    %78 = vector.broadcast %22 : vector<2x1xf32> to vector<2x16xf32>
    %79 = arith.addf %77, %78 : vector<2x16xf32>
    %80 = vector.broadcast %21 : vector<2x1xf32> to vector<2x16xf32>
    %81 = arith.mulf %80, %56 : vector<2x16xf32>
    %82 = arith.mulf %81, %74 : vector<2x16xf32>
    %83 = vector.broadcast %23 : vector<2x1xf32> to vector<2x16xf32>
    %84 = arith.addf %82, %83 : vector<2x16xf32>
    %85 = arith.subf %9, %79 : vector<2x16xf32>
    %86 = arith.mulf %85, %85 : vector<2x16xf32>
    %87 = arith.subf %11, %84 : vector<2x16xf32>
    %88 = arith.mulf %87, %87 : vector<2x16xf32>
    %89 = arith.addf %86, %88 : vector<2x16xf32>
    %90 = tpu.iota {dimensions = array<i32: 1>} : vector<1x16xi32>
    %c0_i32 = arith.constant 0 : i32
    %91 = vector.broadcast %c0_i32 : i32 to vector<1x16xi32>
    %92 = arith.cmpi eq, %90, %91 : vector<1x16xi32>
    %c2_i32 = arith.constant 2 : i32
    %93 = vector.broadcast %c2_i32 : i32 to vector<1x16xi32>
    %94 = arith.cmpi eq, %90, %93 : vector<1x16xi32>
    %95 = arith.ori %92, %94 : vector<1x16xi1>
    %c5_i32 = arith.constant 5 : i32
    %96 = vector.broadcast %c5_i32 : i32 to vector<1x16xi32>
    %97 = arith.cmpi eq, %90, %96 : vector<1x16xi32>
    %98 = arith.ori %95, %97 : vector<1x16xi1>
    %c8_i32 = arith.constant 8 : i32
    %99 = vector.broadcast %c8_i32 : i32 to vector<1x16xi32>
    %100 = arith.cmpi eq, %90, %99 : vector<1x16xi32>
    %101 = arith.ori %98, %100 : vector<1x16xi1>
    %c11_i32 = arith.constant 11 : i32
    %102 = vector.broadcast %c11_i32 : i32 to vector<1x16xi32>
    %103 = arith.cmpi eq, %90, %102 : vector<1x16xi32>
    %104 = arith.ori %101, %103 : vector<1x16xi1>
    %c15_i32 = arith.constant 15 : i32
    %105 = vector.broadcast %c15_i32 : i32 to vector<1x16xi32>
    %106 = arith.cmpi eq, %90, %105 : vector<1x16xi32>
    %107 = arith.ori %104, %106 : vector<1x16xi1>
    %cst_16 = arith.constant 0.000000e+00 : f32
    %108 = vector.shape_cast %107 : vector<1x16xi1> to vector<1x16xi1>
    %109 = vector.broadcast %108 : vector<1x16xi1> to vector<2x16xi1>
    %110 = vector.broadcast %cst_16 : f32 to vector<2x16xf32>
    %111 = arith.select %109, %89, %110 : vector<2x16xi1>, vector<2x16xf32>
    %112 = vector.shape_cast %111 : vector<2x16xf32> to vector<1x2x16xf32>
    %cst_17 = arith.constant dense<0.000000e+00> : vector<1xf32>
    %113 = vector.multi_reduction <add>, %112, %cst_17 [1, 2] : vector<1x2x16xf32> to vector<1xf32>
    %114 = vector.shape_cast %113 : vector<1xf32> to vector<1x1x1xf32>
    %115 = vector.extract %114[0, 0, 0] : f32 from vector<1x1x1xf32>
    %116 = arith.subf %19, %24 : vector<2x1xf32>
    %117 = arith.mulf %116, %116 : vector<2x1xf32>
    %118 = vector.shape_cast %117 : vector<2x1xf32> to vector<1x2x1xf32>
    %cst_18 = arith.constant dense<0.000000e+00> : vector<1xf32>
    %119 = vector.multi_reduction <add>, %118, %cst_18 [1, 2] : vector<1x2x1xf32> to vector<1xf32>
    %120 = vector.shape_cast %119 : vector<1xf32> to vector<1x1x1xf32>
    %121 = vector.extract %120[0, 0, 0] : f32 from vector<1x1x1xf32>
    %cst_19 = arith.constant 1.000000e+00 : f32
    %122 = arith.mulf %cst_19, %115 : f32
    %cst_20 = arith.constant 1.000000e+04 : f32
    %123 = arith.mulf %cst_20, %121 : f32
    %124 = arith.addf %122, %123 : f32
    %c0_21 = arith.constant 0 : index
    %c0_22 = arith.constant 0 : index
    %125 = memref.load %arg7[%c0_21, %c0_22] : memref<1x1xf32, #tpu.memory_space<smem>>
    memref.store %124, %arg7[%c0_21, %c0_22] : memref<1x1xf32, #tpu.memory_space<smem>>
    return
  }
}

</mosaic_0001>

<bundles_post_ra>
// kernel: tpu_custom_call.1
= control target key start
LH: loop header
LB: loop body
LE: loop exit
PB: predicated region body
PF: predicated region fallthrough
CT: control target
= control target key end

     0   :  { %v481_v2 = vmov 0   ;;  %s638_s0 = inlined_call_operand.vmem [shape: f32[2,16,3], index: 0, kind: input, shape index: {}]   ;;  %s639_s1 = inlined_call_operand.vmem [shape: f32[2,16,2], index: 1, kind: input, shape index: {}]   ;;  %s640_s2 = inlined_call_operand.vmem [shape: f32[2,3,3], index: 2, kind: input, shape index: {}]   ;;  %s641_s3 = inlined_call_operand.vmem [shape: f32[2,3], index: 3, kind: input, shape index: {}]   ;;  %s642_s4 = inlined_call_operand.vmem [shape: f32[2,2], index: 4, kind: input, shape index: {}]   ;;  %s643_s5 = inlined_call_operand.vmem [shape: f32[2,2], index: 5, kind: input, shape index: {}]   ;;  %s644_s6 = inlined_call_operand.vmem [shape: f32[2,3], index: 6, kind: input, shape index: {}]   ;;  %s645_s7 = inlined_call_operand.hbm [shape: f32[1,1], index: 7, kind: output, shape index: {}]  }
   0x1   :  { %v29_v0 = vld [vmem:[%s638_s0 + $0x10] sm:$0xff]  ;;  %v27_v1 = vld [vmem:[%s638_s0] sm:$0xff]  ;;  %436 = vset.pattern.permute.xlu1 %v481_v2  ;;  %435 = vset.pattern.permute.xlu0 %v481_v2 }
   0x2   :  { %12 = vsyncpa [#allocation3], 0  ;;  %v482_v3 = vmov 1   ;;  %62 = vperm.xlu1 %436, %v29_v0   ;;  %56 = vperm.xlu0 %435, %v27_v1   ;;  %v30_v4 = vld [vmem:[%s638_s0 + $0x18] sm:$0xff]  ;;  %v28_v5 = vld [vmem:[%s638_s0 + $0x8] sm:$0xff]  ;;  %v483_v6 = vmov 2   ;;  %v67_v24 = vlaneseq }
   0x3   :  { %437 = vset.pattern.permute.xlu2 %v482_v3  ;;  %v35_v7 = vld [vmem:[%s640_s2] sm:$0x7]  ;;  %v36_v8 = vld [vmem:[%s640_s2 + $0x4] sm:$0x7]  ;;  %vm72_vm0 = vcmask 130112   ;;  %vm209_vm7 = vcmask 1041409  }
   0x4   :  { %90 = vperm.xlu2 %437, %v27_v1   ;;  %v552_v9 = vld [vmem:[%s641_s3] sm:$0x3]  ;;  %v566_v25 = vand.u32 127, %v67_v24  ;;  %v578_v38 = vshrl.u32 %v67_v24, 7  ;;  %s484_s16 = smov 127   ;;  %s485_s24 = smov 126  }
   0x5   :  { %v39_v10 = vld [vmem:[%s643_s5] sm:$0x3]  ;;  %s415_s28 = sshll.u32 %s645_s7, 4  ;;  %s486_s8 = smov [#allocation2]   ;;  %s416_s28 = int_to_ptr.hbm [resolvable:$true] %s415_s28 }
   0x6   :  { %v38_v11 = vld [vmem:[%s642_s4] sm:$0x3]  ;;  %v569_v29 = vadd.s32 4294967288, %v566_v25  ;;  %v586_v47 = vadd.s32 8, %v578_v38  ;;  %vm340_vm10 = vcmp.eq.s32.totalorder %v566_v25, 0  ;;  %vm341_vm11 = vcmp.eq.s32.totalorder %v566_v25, 2 }
   0x7   :  { %vm342_vm12 = vmor %vm340_vm10, %vm341_vm11  ;;  %vm343_vm13 = vcmp.eq.s32.totalorder %v566_v25, 5  ;;  %vm345_vm15 = vcmp.eq.s32.totalorder %v566_v25, 8 }
   0x8   :  { %vm344_vm14 = vmor %vm342_vm12, %vm343_vm13 }
   0xa   :  { %65 = vperm.xlu1 %436, %v30_v4   ;;  %59 = vperm.xlu0 %435, %v28_v5  }
   0xc   :  { %93 = vperm.xlu2 %437, %v28_v5  }
  0x12   :  { %439 = vset.pattern.permute.xlu1 %v482_v3  ;;  %438 = vset.pattern.permute.xlu0 %v482_v3 }
  0x13   :  { %99 = vperm.xlu1 %439, %v30_v4   ;;  %96 = vperm.xlu0 %438, %v29_v0  }
  0x14   :  { %440 = vset.pattern.permute.xlu2 %v483_v6 }
  0x15   :  { %122 = vperm.xlu2 %440, %v27_v1  }
  0x1b   :  { %441 = vset.pattern.permute.xlu1 %v483_v6  ;;  %442 = vset.pattern.permute.xlu0 %v483_v6 }
  0x1c   :  { %125 = vperm.xlu1 %441, %v28_v5   ;;  %131 = vperm.xlu0 %442, %v30_v4  }
  0x1d   :  { %128 = vperm.xlu2 %440, %v29_v0  }
  0x24   :  { %443 = vset.pattern.permute.xlu1 %v481_v2  ;;  %114 = vperm.xlu0 %442, %v35_v7  }
  0x25   :  { %444 = vset.pattern.permute.xlu2 %v481_v2  ;;  %43 = vperm.xlu1 %443, %v35_v7  }
  0x26   :  { %48 = vperm.xlu2 %444, %v36_v8  }
  0x2c   :  { %449 = vset.pattern.permute.xlu0 %v482_v3 }
  0x2d   :  { %445 = vset.pattern.permute.xlu1 %v482_v3  ;;  %155 = vperm.xlu0 %449, %v552_v9  }
  0x2e   :  { %446 = vset.pattern.permute.xlu2 %v482_v3  ;;  %82 = vperm.xlu1 %445, %v35_v7  }
  0x2f   :  { %86 = vperm.xlu2 %446, %v36_v8  }
  0x35   :  { %454 = vset.pattern.permute.xlu0 %v481_v2 }
  0x36   :  { %447 = vset.pattern.permute.xlu1 %v483_v6  ;;  %222 = vperm.xlu0 %454, %v39_v10  }
  0x37   :  { %448 = vset.pattern.permute.xlu2 %v483_v6  ;;  %118 = vperm.xlu1 %447, %v36_v8  }
  0x38   :  { %163 = vperm.xlu2 %448, %v552_v9  }
  0x3e   :  { %457 = vset.pattern.permute.xlu0 %v578_v38 }
  0x3f   :  { %450 = vset.pattern.permute.xlu1 %v482_v3 }
  0x40   :  { %451 = vset.pattern.permute.xlu2 %v482_v3  ;;  %227 = vperm.xlu1 %450, %v38_v11  }
  0x41   :  { %238 = vperm.xlu2 %451, %v39_v10  }
  0x48   :  { %452 = vset.pattern.permute.xlu1 %v481_v2 }
  0x49   :  { %453 = vset.pattern.permute.xlu2 %v481_v2  ;;  %147 = vperm.xlu1 %452, %v552_v9  }
  0x4a   :  { %203 = vperm.xlu2 %453, %v38_v11  }
  0x51   :  { %455 = vset.pattern.permute.xlu1 %v578_v38 }
  0x52   :  { %456 = vset.pattern.permute.xlu2 %v586_v47 }
  0x5e   :  { %v91_v12 = vpop.permute.xlu2 %90 }
  0x5f   :  { %v101_v30 = vperm.slane %v91_v12, %v566_v25 }
  0x66   :  { %v94_v13 = vpop.permute.xlu2 %93 }
  0x67   :  { %v102_v31 = vperm.slane %v94_v13, %v569_v29 }
  0x69   :  { %v103_v43 = vsel %vm72_vm0, %v102_v31, %v101_v30 }
  0x6f   :  { %v123_v16 = vpop.permute.xlu2 %122 }
  0x70   :  { %v133_v39 = vperm.slane %v123_v16, %v566_v25 }
  0x74   :  { %v63_v14 = vpop.permute.xlu1 %62  ;;  %v57_v15 = vpop.permute.xlu0 %56 }
  0x75   :  { %v69_v32 = vperm.slane %v57_v15, %v566_v25  ;;  %v74_v48 = vperm.slane %v63_v14, %v566_v25 }
  0x77   :  { %v129_v19 = vpop.permute.xlu2 %128 }
  0x78   :  { %v136_v58 = vperm.slane %v129_v19, %v566_v25 }
  0x7c   :  { %v66_v17 = vpop.permute.xlu1 %65  ;;  %v60_v18 = vpop.permute.xlu0 %59 }
  0x7d   :  { %v71_v33 = vperm.slane %v60_v18, %v569_v29  ;;  %v75_v44 = vperm.slane %v66_v17, %v569_v29 }
  0x7f   :  { %v73_v41 = vsel %vm72_vm0, %v71_v33, %v69_v32  ;;  %v76_v54 = vsel %vm72_vm0, %v75_v44, %v74_v48 }
  0x80   :  { %v49_v22 = vpop.permute.xlu2 %48 }
  0x81   :  { %v80_v60 = vmul.f32 %v76_v54, %v49_v22 }
  0x85   :  { %v100_v20 = vpop.permute.xlu1 %99  ;;  %v97_v21 = vpop.permute.xlu0 %96 }
  0x86   :  { %v105_v35 = vperm.slane %v100_v20, %v569_v29  ;;  %v104_v36 = vperm.slane %v97_v21, %v566_v25 }
  0x88   :  { %v106_v50 = vsel %vm72_vm0, %v105_v35, %v104_v36 }
  0x89   :  { %v87_v27 = vpop.permute.xlu2 %86 }
  0x8a   :  { %v110_v57 = vmul.f32 %v106_v50, %v87_v27 }
  0x8c   :  { %v112_v63 = vadd.f32 %v110_v57, %v80_v60 }
  0x8e   :  { %v126_v23 = vpop.permute.xlu1 %125  ;;  %v132_v26 = vpop.permute.xlu0 %131 }
  0x8f   :  { %v134_v34 = vperm.slane %v126_v23, %v569_v29  ;;  %v137_v55 = vperm.slane %v132_v26, %v569_v29 }
  0x91   :  { %v135_v49 = vsel %vm72_vm0, %v134_v34, %v133_v39  ;;  %v138_v62 = vsel %vm72_vm0, %v137_v55, %v136_v58 }
  0x92   :  { %v164_v37 = vpop.permute.xlu2 %163 }
  0x93   :  { %v165_v53 = vrot.slane %v164_v37, 6  ;;  %v166_v0 = vrot.slane %v164_v37, 7 }
  0x96   :  { %v115_v40 = vpop.permute.xlu0 %114 }
  0x97   :  { %v44_v28 = vpop.permute.xlu1 %43  ;;  %v141_v51 = vmul.f32 %v135_v49, %v115_v40 }
  0x98   :  { %v79_v45 = vmul.f32 %v73_v41, %v44_v28 }
  0x9b   :  { %v239_v14 = vpop.permute.xlu2 %238 }
  0x9f   :  { %v156_v10 = vpop.permute.xlu0 %155 }
  0xa0   :  { %v83_v42 = vpop.permute.xlu1 %82  ;;  %v157_v13 = vrot.slane %v156_v10, 7 }
  0xa1   :  { %v109_v46 = vmul.f32 %v103_v43, %v83_v42 }
  0xa3   :  { %v111_v52 = vadd.f32 %v109_v46, %v79_v45 }
  0xa4   :  { %v204_v41 = vpop.permute.xlu2 %203 }
  0xa5   :  { %v143_v56 = vadd.f32 %v141_v51, %v111_v52 }
  0xa7   :  { %v169_v59 = vadd.f32 %v165_v53, %v143_v56  ;;  %v160_v20 = vadd.f32 %v157_v13, %v143_v56 }
  0xa8   :  { %v223_v51 = vpop.permute.xlu0 %222 }
  0xa9   :  { %463 = vrcp.f32 %v169_v59  ;;  %v119_v61 = vpop.permute.xlu1 %118  ;;  %v182_v17 = vand.u32 2147483648, %v169_v59  ;;  %vm176_vm2 = vweird.f32 %v169_v59  ;;  %v180_v18 = vand.u32 2147483647, %v169_v59 }
  0xaa   :  { %v142_v1 = vmul.f32 %v138_v62, %v119_v61  ;;  %v232_v35 = vrot.slane %v160_v20, 1 }
  0xab   :  { %v183_v27 = vor.u32 1.1754944e-38, %v182_v17  ;;  %vm181_vm5 = vcmp.eq.f32.partialorder %v180_v18, 8.507059e+37 }
  0xac   :  { %v144_v3 = vadd.f32 %v142_v1, %v112_v63  ;;  %v34_v1 = vld [vmem:[%s639_s1 + $0x18] sm:$0xff] }
  0xae   :  { %v170_v4 = vadd.f32 %v166_v0, %v144_v3  ;;  %v161_v30 = vadd.f32 %v156_v10, %v144_v3 }
  0xaf   :  { %v464_v5 = vpop.eup %463 }
  0xb0   :  { %v172_v6 = vmul.f32 %v464_v5, %v169_v59  ;;  %465 = vrcp.f32 %v170_v4  ;;  %vm177_vm1 = vweird.f32 %v464_v5  ;;  %v197_v21 = vand.u32 2147483648, %v170_v4  ;;  %v32_v59 = vld [vmem:[%s639_s1 + $0x8] sm:$0xff] }
  0xb1   :  { %vm178_vm3 = vmor %vm176_vm2, %vm177_vm1  ;;  %v195_v24 = vand.u32 2147483647, %v170_v4  ;;  %vm191_vm6 = vweird.f32 %v170_v4  ;;  %v233_v42 = vsel %vm209_vm7, %v161_v30, %v232_v35  ;;  %vm347_vm2 = vcmp.eq.s32.totalorder %v566_v25, 11 }
  0xb2   :  { %v173_v7 = vsub.f32 1.0, %v172_v6  ;;  %v228_v8 = vpop.permute.xlu1 %227  ;;  %v198_v33 = vor.u32 1.1754944e-38, %v197_v21  ;;  %vm346_vm1 = vmor %vm344_vm14, %vm345_vm15 }
  0xb3   :  { %vm196_vm9 = vcmp.eq.f32.partialorder %v195_v24, 8.507059e+37  ;;  %v235_v45 = vmul.f32 %v233_v42, %v228_v8 }
  0xb4   :  { %v174_v11 = vmul.f32 %v464_v5, %v173_v7 }
  0xb6   :  { %v466_v12 = vpop.eup %465  ;;  %v175_v15 = vadd.f32 %v464_v5, %v174_v11 }
  0xb7   :  { %v187_v16 = vmul.f32 %v466_v12, %v170_v4  ;;  %vm192_vm4 = vweird.f32 %v466_v12 }
  0xb8   :  { %v179_v22 = vsel %vm178_vm3, %v464_v5, %v175_v15  ;;  %vm193_vm8 = vmor %vm191_vm6, %vm192_vm4  ;;  %v33_v5 = vld [vmem:[%s639_s1 + $0x10] sm:$0xff]  ;;  %vm349_vm4 = vcmp.eq.s32.totalorder %v566_v25, 15 }
  0xb9   :  { %v188_v19 = vsub.f32 1.0, %v187_v16  ;;  %v184_v32 = vsel %vm181_vm5, %v183_v27, %v179_v22  ;;  %vm348_vm3 = vmor %vm346_vm1, %vm347_vm2 }
  0xba   :  { %v215_v43 = vrot.slane %v184_v32, 2  ;;  %v40_v32 = vld [vmem:[%s644_s6] sm:$0x3]  ;;  %vm350_vm5 = vmor %vm348_vm3, %vm349_vm4 }
  0xbb   :  { %v189_v23 = vmul.f32 %v466_v12, %v188_v19  ;;  %v148_v26 = vpop.permute.xlu1 %147 }
  0xbc   :  { %v149_v28 = vrot.slane %v148_v26, 1  ;;  %v152_v39 = vadd.f32 %v148_v26, %v143_v56 }
  0xbd   :  { %v190_v31 = vadd.f32 %v466_v12, %v189_v23 }
  0xbe   :  { %v153_v34 = vadd.f32 %v149_v28, %v144_v3 }
  0xbf   :  { %v194_v36 = vsel %vm193_vm8, %v466_v12, %v190_v31  ;;  %vm378_vm8 = vcmask 123904  }
  0xc0   :  { %v199_v37 = vsel %vm196_vm9, %v198_v33, %v194_v36  ;;  %v208_v40 = vrot.slane %v153_v34, 7  ;;  %v389_v34 = vsub.f32 %v552_v9, %v40_v32  ;;  %vm395_vm9 = vcmask 1024  }
  0xc1   :  { %v216_v44 = vrot.slane %v199_v37, 1 }
  0xc2   :  { %v210_v46 = vsel %vm209_vm7, %v208_v40, %v152_v39  ;;  %v390_v35 = vmul.f32 %v389_v34, %v389_v34  ;;  %v351_v40 = vsel %vm350_vm5, 1, %v481_v2 }
  0xc3   :  { %v217_v48 = vsel %vm209_vm7, %v216_v44, %v215_v43  ;;  %v212_v49 = vmul.f32 %v210_v46, %v204_v41  ;;  %vm352_vm6 = vcmp.eq.s32.totalorder %v351_v40, 1 }
  0xc4   :  { %v236_v50 = vmul.f32 %v235_v45, %v217_v48 }
  0xc5   :  { %v219_v52 = vmul.f32 %v217_v48, %v212_v49 }
  0xc6   :  { %v241_v53 = vadd.f32 %v239_v14, %v236_v50 }
  0xc7   :  { %v225_v54 = vadd.f32 %v223_v51, %v219_v52 }
  0xc8   :  { %v282_v55 = vperm.slane %v241_v53, 0  ;;  %v295_v56 = vperm.slane %v241_v53, 1 }
  0xc9   :  { %v243_v57 = vperm.slane %v225_v54, 0  ;;  %v256_v58 = vperm.slane %v225_v54, 1 }
  0xca   :  { %293 = vperm.xlu2 %456, %v282_v55   ;;  %287 = vperm.xlu1 %455, %v282_v55  }
  0xcb   :  { %248 = vperm.xlu0 %457, %v243_v57  }
  0xd2   :  { %306 = vperm.xlu2 %456, %v295_v56   ;;  %300 = vperm.xlu1 %455, %v295_v56  }
  0xd3   :  { %460 = vset.pattern.permute.xlu0 %v481_v2 }
  0xda   :  { %459 = vset.pattern.permute.xlu2 %v578_v38  ;;  %458 = vset.pattern.permute.xlu1 %v586_v47  ;;  %v31_v38 = vld [vmem:[%s639_s1] sm:$0xff] }
  0xe2   :  { %261 = vperm.xlu2 %459, %v256_v58   ;;  %254 = vperm.xlu1 %458, %v243_v57  }
  0xea   :  { %267 = vperm.xlu1 %458, %v256_v58   ;;  %462 = vset.pattern.permute.xlu2 %v481_v2 }
  0xf2   :  { %461 = vset.pattern.permute.xlu1 %v481_v2 }
 0x124   :  { %v294_v60 = vpop.permute.xlu2 %293 }
 0x125   :  { %v313_v61 = vsub.f32 %v32_v59, %v294_v60 }
 0x127   :  { %v317_v62 = vmul.f32 %v313_v61, %v313_v61 }
 0x129   :  { %326 = vrot.lane.b32.xlu0 %v317_v62, %s484_s16 }
 0x12c   :  { %v307_v3 = vpop.permute.xlu2 %306 }
 0x12d   :  { %v315_v4 = vsub.f32 %v34_v1, %v307_v3 }
 0x12f   :  { %v319_v8 = vmul.f32 %v315_v4, %v315_v4 }
 0x13c   :  { %v288_v47 = vpop.permute.xlu1 %287  ;;  %v262_v12 = vpop.permute.xlu2 %261 }
 0x13d   :  { %v312_v63 = vsub.f32 %v31_v38, %v288_v47  ;;  %v249_v13 = vpop.permute.xlu0 %248  ;;  %v275_v28 = vsub.f32 %v33_v5, %v262_v12 }
 0x13e   :  { %v273_v14 = vsub.f32 %v31_v38, %v249_v13 }
 0x13f   :  { %v316_v0 = vmul.f32 %v312_v63, %v312_v63  ;;  %v279_v30 = vmul.f32 %v275_v28, %v275_v28 }
 0x140   :  { %v277_v16 = vmul.f32 %v273_v14, %v273_v14 }
 0x141   :  { %324 = vrot.lane.b32.xlu2 %v316_v0, %s484_s16 }
 0x144   :  { %v301_v6 = vpop.permute.xlu1 %300 }
 0x145   :  { %v314_v7 = vsub.f32 %v33_v5, %v301_v6 }
 0x147   :  { %v318_v10 = vmul.f32 %v314_v7, %v314_v7 }
 0x149   :  { %330 = vrot.lane.b32.xlu2 %v319_v8, %s484_s16  ;;  %328 = vrot.lane.b32.xlu1 %v318_v10, %s484_s16 }
 0x154   :  { %v255_v11 = vpop.permute.xlu1 %254 }
 0x155   :  { %v274_v15 = vsub.f32 %v32_v59, %v255_v11 }
 0x157   :  { %v278_v17 = vmul.f32 %v274_v15, %v274_v15 }
 0x15c   :  { %v268_v18 = vpop.permute.xlu1 %267 }
 0x15d   :  { %v276_v23 = vsub.f32 %v34_v1, %v268_v18 }
 0x15f   :  { %v280_v24 = vmul.f32 %v276_v23, %v276_v23 }
 0x19b   :  { %v325_v19 = vpop.permute.xlu2 %324  ;;  %v327_v20 = vpop.permute.xlu0 %326 }
 0x19c   :  { %v336_v21 = vadd.f32 %v325_v19, %v277_v16  ;;  %v337_v22 = vadd.f32 %v327_v20, %v278_v17 }
 0x19e   :  { %358 = vperm.xlu0 %460, %v336_v21   ;;  %361 = vperm.xlu1 %461, %v337_v22  }
 0x1a3   :  { %v331_v26 = vpop.permute.xlu2 %330 }
 0x1a4   :  { %v339_v27 = vadd.f32 %v331_v26, %v280_v24 }
 0x1a6   :  { %367 = vperm.xlu1 %461, %v339_v27  }
 0x1bb   :  { %v329_v31 = vpop.permute.xlu1 %328 }
 0x1bc   :  { %v338_v33 = vadd.f32 %v329_v31, %v279_v30 }
 0x1be   :  { %364 = vperm.xlu2 %462, %v338_v33  }
 0x1c6   :  { %392 = vrot.lane.b32.xlu2 %v390_v35, %s485_s24 }
 0x210   :  { %v362_v36 = vpop.permute.xlu1 %361  ;;  %v359_v9 = vpop.permute.xlu0 %358 }
 0x211   :  { %v370_v37 = vperm.slane %v362_v36, %v569_v29  ;;  %v369_v39 = vperm.slane %v359_v9, %v566_v25 }
 0x213   :  { %v371_v45 = vsel %vm72_vm0, %v370_v37, %v369_v39 }
 0x218   :  { %v365_v41 = vpop.permute.xlu2 %364  ;;  %v368_v42 = vpop.permute.xlu1 %367 }
 0x219   :  { %v372_v43 = vperm.slane %v365_v41, %v566_v25  ;;  %v373_v44 = vperm.slane %v368_v42, %v569_v29 }
 0x21b   :  { %v374_v46 = vsel %vm72_vm0, %v373_v44, %v372_v43 }
 0x21c   :  { %v375_v48 = vsel %vm209_vm7, %v374_v46, %v371_v45 }
 0x21d   :  { %v377_v49 = vsel %vm352_vm6, %v375_v48, 0.0 }
 0x21e   :  { %v379_v50 = vsel %vm378_vm8, %v377_v49, 0.0 }
 0x21f   :  { %380 = vadd.xlane.f32.xlu0 %v379_v50 }
 0x220   :  { %v393_v51 = vpop.permute.xlu2 %392 }
 0x221   :  { %v396_v2 = vsel %vm395_vm9, %v393_v51, 0.0 }
 0x222   :  { %397 = vadd.xlane.f32.xlu1 %v396_v2 }
 0x292   :  { %v381_v52 = vpop.xlane.xlu0 %380 }
 0x293   :  { %v382_v53 = vrot.slane %v381_v52, 4 }
 0x295   :  { %v383_v25 = vadd.f32 %v382_v53, %v381_v52  ;;  %v398_v54 = vpop.xlane.xlu1 %397 }
 0x296   :  { %v399_v29 = vrot.slane %v398_v54, 4 }
 0x297   :  { %v384_v55 = vrot.slane %v383_v25, 2 }
 0x298   :  { %v400_v57 = vadd.f32 %v399_v29, %v398_v54 }
 0x299   :  { %v385_v56 = vadd.f32 %v384_v55, %v383_v25 }
 0x29a   :  { %v401_v58 = vrot.slane %v400_v57, 2 }
 0x29b   :  { %v386_v59 = vrot.slane %v385_v56, 1 }
 0x29c   :  { %v402_v60 = vadd.f32 %v401_v58, %v400_v57 }
 0x29d   :  { %v387_v61 = vadd.f32 %v386_v59, %v385_v56 }
 0x29e   :  { %v403_v62 = vrot.slane %v402_v60, 1 }
 0x29f   :  { %425 = vpush %v387_v61 }
 0x2a0   :  { %v404_v38 = vadd.f32 %v403_v62, %v402_v60 }
 0x2a2   :  { %427 = vpush %v404_v38 }
 0x2d0   :  { %s426_s6 = spop %425 }
 0x2d3   :  { %s428_s25 = spop %427 }
 0x2d4   :  { %s406_s29 = smul.f32 10000.0, %s428_s25 }
 0x2d6   :  { %s407_s30 = sadd.f32 %s426_s6, %s406_s29 }
 0x2d8   :  { %409 = sst [smem:[#allocation2]] %s407_s30 }
 0x2d9   :  { %418 = dma.smem_to_hbm %s486_s8, 16, %s416_s28, [#allocation3]  }
 0x2da   :  { %479 = dma.done.wait [#allocation3], 16  }
 0x2db   :  { %480 = vsyncadd [#allocation3], 4294967280 }
 0x2dc   :  { %423 = sfence }
 0x2dd   :  { %424 = vsyncpa [#allocation3], 1 }

</bundles_post_ra>
